<compile_context>
chip_gen: v7x
topology: tpu7x:2x2x1
jax: 0.10.0
libtpu: 0.0.40
codegen_flags: <defaults>
</compile_context>

<pallas_src>
import jax
import jax.numpy as jnp
from jax import lax
from jax.experimental import pallas as pl
from jax.experimental.pallas import tpu as pltpu


def linear_relu_kernel(x_ref, w_ref, o_ref):
    # x_ref: (B, in_features), w_ref: (out_features, in_features) — PyTorch layout.
    # Contract in_features of both operands directly (o = x @ W.T) on the MXU;
    # no kernel- or wrapper-side transpose needed.
    x = x_ref[...]
    w = w_ref[...]
    y = lax.dot_general(
        x, w,
        dimension_numbers=(((1,), (1,)), ((), ())),
        preferred_element_type=jnp.float32,
    )
    o_ref[...] = jnp.maximum(y, 0.0).astype(o_ref.dtype)


def linear_relu(x, weight):
    """x: (B, in_features) f32; weight: (out_features, in_features) f32 (PyTorch layout)."""
    b, din = x.shape
    dout, din_w = weight.shape
    assert din == din_w, "weight in_features must match x"

    # Grid-less call: whole arrays are resident in VMEM, single kernel invocation.
    return pl.pallas_call(
        linear_relu_kernel,
        out_shape=jax.ShapeDtypeStruct((b, dout), x.dtype),
        in_specs=[
            pl.BlockSpec(memory_space=pltpu.MemorySpace.VMEM),
            pl.BlockSpec(memory_space=pltpu.MemorySpace.VMEM),
        ],
        out_specs=pl.BlockSpec(memory_space=pltpu.MemorySpace.VMEM),
    )(x, weight)


if __name__ == "__main__":
    key = jax.random.PRNGKey(0)
    kx, kw = jax.random.split(key)

    # Module-implied shapes: x1 is (1, 10), Linear weight is (10, 10) (out, in).
    x1 = jax.random.normal(kx, (1, 10), dtype=jnp.float32)
    # Deterministic weight init mimicking nn.Linear's uniform(-1/sqrt(in), 1/sqrt(in)).
    bound = 1.0 / jnp.sqrt(10.0)
    weight = jax.random.uniform(kw, (10, 10), dtype=jnp.float32,
                                minval=-bound, maxval=bound)

    out = linear_relu(x1, weight)
    out = jax.block_until_ready(out)

    # Reference check in plain JAX (same semantics as the PyTorch forward).
    ref = jnp.maximum(x1 @ weight.T, 0.0)
    assert out.shape == (1, 10)
    assert jnp.allclose(out, ref, atol=1e-5, rtol=1e-5)

    print("KERNEL_OK")
</pallas_src>

<mosaic_0001>
module attributes {stable_mosaic.version = 11 : i64} {
  func.func @linear_relu_kernel(%arg0: memref<1x10xf32, #tpu.memory_space<vmem>>, %arg1: memref<10x10xf32, #tpu.memory_space<vmem>>, %arg2: memref<1x10xf32, #tpu.memory_space<vmem>>) attributes {dimension_semantics = [], scalar_prefetch = 0 : i64, scratch_operands = 0 : i64, tpu.core_type = #tpu.core_type<tc>} {
    %c0 = arith.constant 0 : index
    %c0_0 = arith.constant 0 : index
    %0 = vector.load %arg0[%c0, %c0_0] : memref<1x10xf32, #tpu.memory_space<vmem>>, vector<1x10xf32>
    %c0_1 = arith.constant 0 : index
    %c0_2 = arith.constant 0 : index
    %1 = vector.load %arg1[%c0_1, %c0_2] : memref<10x10xf32, #tpu.memory_space<vmem>>, vector<10x10xf32>
    %cst = arith.constant dense<0.000000e+00> : vector<1x10xf32>
    %2 = tpu.matmul %0, %1, %cst {dimension_numbers = #tpu.dot_dimension_numbers<[1], [1], [0], [0], [0, 0, 1, 0], [], []>} : vector<1x10xf32>, vector<10x10xf32>, vector<1x10xf32> -> vector<1x10xf32>
    %cst_3 = arith.constant 0.000000e+00 : f32
    %3 = vector.broadcast %cst_3 : f32 to vector<1x10xf32>
    %4 = arith.maximumf %2, %3 : vector<1x10xf32>
    %c0_4 = arith.constant 0 : index
    %c0_5 = arith.constant 0 : index
    %5 = vector.load %arg2[%c0_4, %c0_5] : memref<1x10xf32, #tpu.memory_space<vmem>>, vector<1x10xf32>
    tpu.vector_store %arg2[%c0_4, %c0_5], %4 {strides = array<i32>} : memref<1x10xf32, #tpu.memory_space<vmem>>, vector<1x10xf32>,
    return
  }
}

</mosaic_0001>

<bundles_post_ra>
// kernel: tpu_custom_call.1
= control target key start
LH: loop header
LB: loop body
LE: loop exit
PB: predicated region body
PF: predicated region fallthrough
CT: control target
= control target key end

     0   :  { %7 = vsyncpa [#allocation3], 0  ;;  %s303_s0 = inlined_call_operand.hbm [shape: f32[1,10], index: 0, kind: input, shape index: {}]   ;;  %s304_s1 = inlined_call_operand.hbm [shape: f32[10,10], index: 1, kind: input, shape index: {}]   ;;  %s305_s2 = inlined_call_operand.hbm [shape: f32[1,10], index: 2, kind: output, shape index: {}]  }
   0x1   :  { %8 = vsyncpa [#allocation6], 0 }
   0x2   :  { %9 = vsyncpa [#allocation4], 0  ;;  %s237_s9 = smov [#allocation2]   ;;  %s238_s11 = smov [#allocation5]  }
   0x3   :  { %s16_s10 = sshll.u32 %s237_s9, 4  ;;  %s25_s12 = sshll.u32 %s238_s11, 4  ;;  %s17_s10 = int_to_ptr.vmem [resolvable:$true] %s16_s10  ;;  %s260_s12 = int_to_ptr.vmem [resolvable:$true] %s25_s12 }
   0x4   :  { %s165_s15 = scalar_lea.hbm %s303_s0, 16 }
   0x5   :  { %p166_p0 = scmp.ne.s32.totalorder %s303_s0, %s165_s15  ;;  %p169_p1 = scmp.lt.u32.totalorder %s165_s15, %s303_s0 }
   0x7   :  { %p171_p2 = pnand %p169_p1, %p166_p0 }
   0x9   :  { %174 = shalt.err (!%p171_p2)
}
   0xa   :  { %s175_s20 = scalar_lea.vmem %s17_s10, 16  ;;  %s179_s21 = scalar_lea.vmem %s17_s10, 32 }
   0xb   :  { %p176_p3 = scmp.ne.s32.totalorder %s17_s10, %s175_s20  ;;  %p180_p4 = scmp.lt.s32.totalorder %s17_s10, %s17_s10 }
   0xc   :  { %p181_p5 = scmp.lt.s32.totalorder %s179_s21, %s175_s20 }
   0xe   :  { %p182_p6 = por %p181_p5, %p180_p4 }
  0x10   :  { %p183_p7 = pnand %p182_p6, %p176_p3 }
  0x12   :  { %186 = shalt.err (!%p183_p7)
}
  0x13   :  { %19 = dma.hbm_to_vmem [thread:$0]  %s303_s0, 16, %s17_s10, [#allocation3]  }
  0x14   :  { %s187_s26 = scalar_lea.hbm %s304_s1, 256 }
  0x15   :  { %p188_p8 = scmp.ne.s32.totalorder %s304_s1, %s187_s26  ;;  %p191_p9 = scmp.lt.u32.totalorder %s187_s26, %s304_s1 }
  0x17   :  { %p193_p10 = pnand %p191_p9, %p188_p8 }
  0x19   :  { %196 = shalt.err (!%p193_p10)
}
  0x1a   :  { %s197_s3 = scalar_lea.vmem %s260_s12, 256  ;;  %p202_p12 = scmp.lt.s32.totalorder %s260_s12, %s260_s12 }
  0x1b   :  { %p198_p11 = scmp.ne.s32.totalorder %s260_s12, %s197_s3  ;;  %p203_p13 = scmp.lt.s32.totalorder %s197_s3, %s197_s3 }
  0x1d   :  { %p204_p0 = por %p203_p13, %p202_p12 }
  0x1f   :  { %p205_p1 = pnand %p204_p0, %p198_p11 }
  0x21   :  { %208 = shalt.err (!%p205_p1)
}
  0x22   :  { %s239_s0 = smov 128   ;;  %s240_s4 = smov 8  }
  0x23   :  { %31 = dma.hbm_to_vmem [thread:$0]  %s304_s1, 256, %s260_s12, [#allocation6], %s239_s0, %s239_s0, %s240_s4  }
  0x24   :  { %231 = dma.done.wait [#allocation3], 16  }
  0x25   :  { %232 = vsyncadd [#allocation3], 4294967280 }
  0x26   :  { %233 = dma.done.wait [#allocation6], 256  }
  0x27   :  { %234 = vsyncadd [#allocation6], 4294967040  ;;  %v241_v0 = vmov 0.0|0.0   ;;  %vm242_vm0 = vmmov 0   ;;  %v243_v1 = vmov 0.0   ;;  %vm41_vm1 = vcmask 80896  }
  0x28   :  { %153 = vmatprep.subr.bf16.mxu0 %v241_v0  ;;  %150 = vmatprep.mubr.msk.f32.mxu0 %vm242_vm0, %v243_v1  ;;  %v39_v2 = vld [vmem:[#allocation5] sm:$0xff]  ;;  %v40_v3 = vld [vmem:[#allocation5 + $0x8] sm:$0x3]  ;;  %vm155_vm2 = vmpackc.low %vm41_vm1, %vm41_vm1  ;;  %s244_s7 = smov [#allocation7]   ;;  %vm122_vm3 = vcmask 73728  }
  0x29   :  { %v154_v4 = vpack.c.bf16 %v40_v3, %v39_v2  ;;  %v38_v5 = vld [vmem:[#allocation2] sm:$0x1]  ;;  %s130_s8 = sshll.u32 %s244_s7, 4  ;;  %s131_s8 = int_to_ptr.vmem [resolvable:$true] %s130_s8 }
  0x2a   :  { %s209_s1 = scalar_lea.vmem %s131_s8, 16  ;;  %s213_s9 = scalar_lea.vmem %s131_s8, 32 }
  0x2b   :  { %156 = vmatpush3.bf16.xpose.msk.msra.mxu0 %vm155_vm2, %v154_v4  ;;  %p210_p2 = scmp.ne.s32.totalorder %s131_s8, %s209_s1  ;;  %p214_p3 = scmp.lt.s32.totalorder %s131_s8, %s131_s8 }
  0x2c   :  { %p215_p4 = scmp.lt.s32.totalorder %s213_s9, %s209_s1 }
  0x2e   :  { %p216_p5 = por %p215_p4, %p214_p3 }
  0x30   :  { %p217_p6 = pnand %p216_p5, %p210_p2 }
  0x32   :  { %151 = vmatmul.mubr.msk.f32.vlgmr.msra.gmra.mrb[0].mxu0 %vm41_vm1, %v38_v5 }
 0x105   :  { %v117_v6 = vpop.f32.mrb[0].mxu0 }
 0x106   :  { %v121_v7 = vmax.f32 %v117_v6, 0.0  ;;  %v152_v8 = vpop.f32.mrb[1].mxu0 }
 0x108   :  { %123 = vst.msk [vmem:[#allocation7] sm:$0x1] %vm122_vm3, %v121_v7 }
 0x109   :  { %220 = shalt.err (!%p217_p6)
}
 0x10a   :  { %s221_s12 = scalar_lea.hbm %s305_s2, 16 }
 0x10b   :  { %p222_p7 = scmp.ne.s32.totalorder %s305_s2, %s221_s12  ;;  %p225_p8 = scmp.lt.u32.totalorder %s221_s12, %s305_s2 }
 0x10d   :  { %p227_p9 = pnand %p225_p8, %p222_p7 }
 0x10f   :  { %230 = shalt.err (!%p227_p9)
}
 0x110   :  { %133 = dma.vmem_to_hbm [thread:$0]  %s131_s8, 16, %s305_s2, [#allocation4]  }
 0x111   :  { %235 = dma.done.wait [#allocation4], 16  }
 0x112   :  { %236 = vsyncadd [#allocation4], 4294967280 }
 0x113   :  { %137 = vsyncpa [#allocation3], 1 }
 0x114   :  { %138 = vsyncpa [#allocation6], 1 }
 0x115   :  { %139 = vsyncpa [#allocation4], 1 }

</bundles_post_ra>
